<compile_context>
chip_gen: v7x
topology: tpu7x:2x2x1
jax: 0.10.0
libtpu: 0.0.40
codegen_flags: <defaults>
</compile_context>

<pallas_src>
import functools

import jax
import jax.numpy as jnp
from jax.experimental import pallas as pl
from jax.experimental.pallas import tpu as pltpu


def _round_up(x, m):
    return ((x + m - 1) // m) * m


def _choose_row_tile(m, tm_max=512):
    """Pick a sublane-aligned row tile <= tm_max that minimizes row padding."""
    m8 = _round_up(m, 8)
    if m8 <= tm_max:
        return m8
    steps = -(-m8 // tm_max)                 # ceil
    return _round_up(-(-m8 // steps), 8)     # ceil(m8/steps), rounded to 8


def _compare_mlp_kernel(xl_ref, xr_ref, w1l_ref, w1r_ref, b1_ref,
                        w2_ref, b2_ref, o_ref):
    """out = relu(relu(left@W1_l + right@W1_r + b1) @ W2 + b2) for one row tile."""
    # First layer: two bf16 MXU dots, f32 accumulation (== [left|right] @ W1).
    h = jnp.dot(xl_ref[...], w1l_ref[...], preferred_element_type=jnp.float32)
    h = h + jnp.dot(xr_ref[...], w1r_ref[...], preferred_element_type=jnp.float32)
    h = jnp.maximum(h + b1_ref[...], 0.0)
    # Second layer: cast hidden to bf16 for the MXU, accumulate in f32.
    y = jnp.dot(h.astype(w2_ref.dtype), w2_ref[...],
                preferred_element_type=jnp.float32) + b2_ref[...]
    o_ref[...] = jnp.maximum(y, 0.0).astype(o_ref.dtype)


@functools.partial(jax.jit, static_argnames=("tm_max",))
def _compare_forward(A, B, beta, alpha, w1, b1, w2, b2, *, tm_max=512):
    """Fused forward pass for both slabs; returns (V_A, V_B)."""
    bsz, sa, e = A.shape
    _, sb, _ = B.shape
    h = w1.shape[1]
    h_pad = _round_up(max(h, 128), 128)      # lane-dense hidden / output dim

    # --- weights: split W1 at the A/beta boundary, pad hidden dim, cast bf16 ---
    w1_bf = w1.astype(jnp.bfloat16)
    w1l = jnp.pad(w1_bf[:e], ((0, 0), (0, h_pad - h)))          # (e, h_pad)
    w1r = jnp.pad(w1_bf[e:], ((0, 0), (0, h_pad - h)))          # (e, h_pad)
    w2p = jnp.pad(w2.astype(jnp.bfloat16),
                  ((0, h_pad - h), (0, h_pad - h)))             # (h_pad, h_pad)
    b1p = jnp.pad(b1, (0, h_pad - h)).reshape(1, h_pad)         # f32
    b2p = jnp.pad(b2, (0, h_pad - h)).reshape(1, h_pad)         # f32

    # --- activations: row-stack the two slabs (A;B) and (beta;alpha), bf16 ---
    # (no feature-axis concat; the cast fuses with this single staging copy)
    left = jnp.concatenate(
        [A.reshape(bsz * sa, e), B.reshape(bsz * sb, e)], axis=0
    ).astype(jnp.bfloat16)
    right = jnp.concatenate(
        [beta.reshape(bsz * sa, e), alpha.reshape(bsz * sb, e)], axis=0
    ).astype(jnp.bfloat16)

    m = left.shape[0]                         # = bsz * (sa + sb)
    tm = _choose_row_tile(m, tm_max)
    m_pad = _round_up(m, tm)
    if m_pad != m:
        left = jnp.pad(left, ((0, m_pad - m), (0, 0)))
        right = jnp.pad(right, ((0, m_pad - m), (0, 0)))

    out = pl.pallas_call(
        _compare_mlp_kernel,
        out_shape=jax.ShapeDtypeStruct((m_pad, h_pad), jnp.float32),
        grid_spec=pltpu.PrefetchScalarGridSpec(
            num_scalar_prefetch=0,
            grid=(m_pad // tm,),
            in_specs=[
                pl.BlockSpec((tm, e), lambda i: (i, 0)),        # left rows
                pl.BlockSpec((tm, e), lambda i: (i, 0)),        # right rows
                pl.BlockSpec((e, h_pad), lambda i: (0, 0)),     # W1[:e]   (resident)
                pl.BlockSpec((e, h_pad), lambda i: (0, 0)),     # W1[e:]   (resident)
                pl.BlockSpec((1, h_pad), lambda i: (0, 0)),     # b1
                pl.BlockSpec((h_pad, h_pad), lambda i: (0, 0)), # W2       (resident)
                pl.BlockSpec((1, h_pad), lambda i: (0, 0)),     # b2
            ],
            out_specs=pl.BlockSpec((tm, h_pad), lambda i: (i, 0)),
        ),
        compiler_params=pltpu.CompilerParams(
            dimension_semantics=("parallel",),
            vmem_limit_bytes=32 * 1024 * 1024,
        ),
    )(left, right, w1l, w1r, b1p, w2p, b2p)

    v_a = out[: bsz * sa, :h].reshape(bsz, sa, h)
    v_b = out[bsz * sa: bsz * sa + bsz * sb, :h].reshape(bsz, sb, h)
    return v_a, v_b


class Compare:
    """JAX/Pallas port of the PyTorch `Compare` module (eval-mode dropout)."""

    def __init__(self, num_inputs, num_hiddens, key):
        self.num_inputs = num_inputs
        self.num_hiddens = num_hiddens
        k1, k2, k3, k4 = jax.random.split(key, 4)
        # Deterministic synthetic init (uniform, same spirit as nn.Linear default).
        lim1 = 1.0 / (num_inputs ** 0.5)
        lim2 = 1.0 / (num_hiddens ** 0.5)
        self.w1 = jax.random.uniform(k1, (num_inputs, num_hiddens),
                                     jnp.float32, -lim1, lim1)
        self.b1 = jax.random.uniform(k2, (num_hiddens,), jnp.float32, -lim1, lim1)
        self.w2 = jax.random.uniform(k3, (num_hiddens, num_hiddens),
                                     jnp.float32, -lim2, lim2)
        self.b2 = jax.random.uniform(k4, (num_hiddens,), jnp.float32, -lim2, lim2)

    def __call__(self, A, B, beta, alpha):
        # Dropout is identity in eval / inference semantics (deterministic kernel).
        return _compare_forward(A, B, beta, alpha,
                                self.w1, self.b1, self.w2, self.b2)


if __name__ == "__main__":
    # Small shapes consistent with the forward pass:
    #   A:     (batch, seq_a, embed)   beta:  (batch, seq_a, embed)
    #   B:     (batch, seq_b, embed)   alpha: (batch, seq_b, embed)
    #   num_inputs = 2 * embed, num_hiddens = hidden
    batch, seq_a, seq_b, embed, hidden = 2, 8, 8, 16, 32

    key = jax.random.PRNGKey(0)
    ka, kb, kbeta, kalpha, kparams = jax.random.split(key, 5)
    A = jax.random.normal(ka, (batch, seq_a, embed), jnp.float32)
    B = jax.random.normal(kb, (batch, seq_b, embed), jnp.float32)
    beta = jax.random.normal(kbeta, (batch, seq_a, embed), jnp.float32)
    alpha = jax.random.normal(kalpha, (batch, seq_b, embed), jnp.float32)

    model = Compare(num_inputs=2 * embed, num_hiddens=hidden, key=kparams)

    V_A, V_B = model(A, B, beta, alpha)
    jax.block_until_ready((V_A, V_B))

    # Pure-JAX f32 reference check (kernel uses bf16 inputs -> loose tolerance).
    def ref_g(x):
        hm = jnp.maximum(jnp.einsum("bsd,dh->bsh", x, model.w1) + model.b1, 0.0)
        return jnp.maximum(jnp.einsum("bsh,hk->bsk", hm, model.w2) + model.b2, 0.0)

    ref_A = ref_g(jnp.concatenate([A, beta], axis=2))
    ref_B = ref_g(jnp.concatenate([B, alpha], axis=2))
    assert V_A.shape == (batch, seq_a, hidden)
    assert V_B.shape == (batch, seq_b, hidden)
    assert jnp.allclose(V_A, ref_A, atol=5e-2, rtol=5e-2)
    assert jnp.allclose(V_B, ref_B, atol=5e-2, rtol=5e-2)

    print("KERNEL_OK")
</pallas_src>

<mosaic_0001>
module attributes {stable_mosaic.version = 11 : i64} {
  func.func @_compare_mlp_kernel(%arg0: i32, %arg1: memref<32x16xbf16, #tpu.memory_space<vmem>>, %arg2: memref<32x16xbf16, #tpu.memory_space<vmem>>, %arg3: memref<16x128xbf16, #tpu.memory_space<vmem>>, %arg4: memref<16x128xbf16, #tpu.memory_space<vmem>>, %arg5: memref<1x128xf32, #tpu.memory_space<vmem>>, %arg6: memref<128x128xbf16, #tpu.memory_space<vmem>>, %arg7: memref<1x128xf32, #tpu.memory_space<vmem>>, %arg8: memref<32x128xf32, #tpu.memory_space<vmem>>) attributes {dimension_semantics = [#tpu.dimension_semantics<parallel>], iteration_bounds = array<i64: 1>, scalar_prefetch = 0 : i64, scratch_operands = 0 : i64, tpu.core_type = #tpu.core_type<tc>, window_params = [{transform_indices = @transform_0, window_bounds = array<i64: 32, 16>}, {transform_indices = @transform_1, window_bounds = array<i64: 32, 16>}, {pipeline_mode = #tpu.pipeline_mode<synchronous>, transform_indices = @transform_2, window_bounds = array<i64: 16, 128>}, {pipeline_mode = #tpu.pipeline_mode<synchronous>, transform_indices = @transform_3, window_bounds = array<i64: 16, 128>}, {pipeline_mode = #tpu.pipeline_mode<synchronous>, transform_indices = @transform_4, window_bounds = array<i64: 1, 128>}, {pipeline_mode = #tpu.pipeline_mode<synchronous>, transform_indices = @transform_5, window_bounds = array<i64: 128, 128>}, {pipeline_mode = #tpu.pipeline_mode<synchronous>, transform_indices = @transform_6, window_bounds = array<i64: 1, 128>}, {transform_indices = @transform_7, window_bounds = array<i64: 32, 128>}]} {
    %c0 = arith.constant 0 : index
    %c0_0 = arith.constant 0 : index
    %0 = vector.load %arg1[%c0, %c0_0] : memref<32x16xbf16, #tpu.memory_space<vmem>>, vector<32x16xbf16>
    %c0_1 = arith.constant 0 : index
    %c0_2 = arith.constant 0 : index
    %1 = vector.load %arg3[%c0_1, %c0_2] : memref<16x128xbf16, #tpu.memory_space<vmem>>, vector<16x128xbf16>
    %cst = arith.constant dense<0.000000e+00> : vector<32x128xf32>
    %2 = tpu.matmul %0, %1, %cst {dimension_numbers = #tpu.dot_dimension_numbers<[1], [0], [0], [1], [0, 0, 1, 1], [], []>} : vector<32x16xbf16>, vector<16x128xbf16>, vector<32x128xf32> -> vector<32x128xf32>
    %c0_3 = arith.constant 0 : index
    %c0_4 = arith.constant 0 : index
    %3 = vector.load %arg2[%c0_3, %c0_4] : memref<32x16xbf16, #tpu.memory_space<vmem>>, vector<32x16xbf16>
    %c0_5 = arith.constant 0 : index
    %c0_6 = arith.constant 0 : index
    %4 = vector.load %arg4[%c0_5, %c0_6] : memref<16x128xbf16, #tpu.memory_space<vmem>>, vector<16x128xbf16>
    %cst_7 = arith.constant dense<0.000000e+00> : vector<32x128xf32>
    %5 = tpu.matmul %3, %4, %cst_7 {dimension_numbers = #tpu.dot_dimension_numbers<[1], [0], [0], [1], [0, 0, 1, 1], [], []>} : vector<32x16xbf16>, vector<16x128xbf16>, vector<32x128xf32> -> vector<32x128xf32>
    %6 = arith.addf %2, %5 : vector<32x128xf32>
    %c0_8 = arith.constant 0 : index
    %c0_9 = arith.constant 0 : index
    %7 = vector.load %arg5[%c0_8, %c0_9] : memref<1x128xf32, #tpu.memory_space<vmem>>, vector<1x128xf32>
    %8 = vector.broadcast %7 : vector<1x128xf32> to vector<32x128xf32>
    %9 = arith.addf %6, %8 : vector<32x128xf32>
    %cst_10 = arith.constant 0.000000e+00 : f32
    %10 = vector.broadcast %cst_10 : f32 to vector<32x128xf32>
    %11 = arith.maximumf %9, %10 : vector<32x128xf32>
    %12 = arith.truncf %11 : vector<32x128xf32> to vector<32x128xbf16>
    %c0_11 = arith.constant 0 : index
    %c0_12 = arith.constant 0 : index
    %13 = vector.load %arg6[%c0_11, %c0_12] : memref<128x128xbf16, #tpu.memory_space<vmem>>, vector<128x128xbf16>
    %cst_13 = arith.constant dense<0.000000e+00> : vector<32x128xf32>
    %14 = tpu.matmul %12, %13, %cst_13 {dimension_numbers = #tpu.dot_dimension_numbers<[1], [0], [0], [1], [0, 0, 1, 1], [], []>} : vector<32x128xbf16>, vector<128x128xbf16>, vector<32x128xf32> -> vector<32x128xf32>
    %c0_14 = arith.constant 0 : index
    %c0_15 = arith.constant 0 : index
    %15 = vector.load %arg7[%c0_14, %c0_15] : memref<1x128xf32, #tpu.memory_space<vmem>>, vector<1x128xf32>
    %16 = vector.broadcast %15 : vector<1x128xf32> to vector<32x128xf32>
    %17 = arith.addf %14, %16 : vector<32x128xf32>
    %cst_16 = arith.constant 0.000000e+00 : f32
    %18 = vector.broadcast %cst_16 : f32 to vector<32x128xf32>
    %19 = arith.maximumf %17, %18 : vector<32x128xf32>
    %c0_17 = arith.constant 0 : index
    %c0_18 = arith.constant 0 : index
    %20 = vector.load %arg8[%c0_17, %c0_18] : memref<32x128xf32, #tpu.memory_space<vmem>>, vector<32x128xf32>
    tpu.vector_store %arg8[%c0_17, %c0_18], %19 {strides = array<i32>} : memref<32x128xf32, #tpu.memory_space<vmem>>, vector<32x128xf32>,
    return
  }
  func.func @transform_0(%arg0: i32) -> (i32, i32) {
    %c0_i32 = arith.constant 0 : i32
    %c0_i32_0 = arith.constant 0 : i32
    return %arg0, %c0_i32 : i32, i32
  }
  func.func @transform_1(%arg0: i32) -> (i32, i32) {
    %c0_i32 = arith.constant 0 : i32
    %c0_i32_0 = arith.constant 0 : i32
    return %arg0, %c0_i32 : i32, i32
  }
  func.func @transform_2(%arg0: i32) -> (i32, i32) {
    %c0_i32 = arith.constant 0 : i32
    %c0_i32_0 = arith.constant 0 : i32
    %c0_i32_1 = arith.constant 0 : i32
    return %c0_i32, %c0_i32_0 : i32, i32
  }
  func.func @transform_3(%arg0: i32) -> (i32, i32) {
    %c0_i32 = arith.constant 0 : i32
    %c0_i32_0 = arith.constant 0 : i32
    %c0_i32_1 = arith.constant 0 : i32
    return %c0_i32, %c0_i32_0 : i32, i32
  }
  func.func @transform_4(%arg0: i32) -> (i32, i32) {
    %c0_i32 = arith.constant 0 : i32
    %c0_i32_0 = arith.constant 0 : i32
    %c0_i32_1 = arith.constant 0 : i32
    return %c0_i32, %c0_i32_0 : i32, i32
  }
  func.func @transform_5(%arg0: i32) -> (i32, i32) {
    %c0_i32 = arith.constant 0 : i32
    %c0_i32_0 = arith.constant 0 : i32
    %c0_i32_1 = arith.constant 0 : i32
    return %c0_i32, %c0_i32_0 : i32, i32
  }
  func.func @transform_6(%arg0: i32) -> (i32, i32) {
    %c0_i32 = arith.constant 0 : i32
    %c0_i32_0 = arith.constant 0 : i32
    %c0_i32_1 = arith.constant 0 : i32
    return %c0_i32, %c0_i32_0 : i32, i32
  }
  func.func @transform_7(%arg0: i32) -> (i32, i32) {
    %c0_i32 = arith.constant 0 : i32
    %c0_i32_0 = arith.constant 0 : i32
    return %arg0, %c0_i32 : i32, i32
  }
}

</mosaic_0001>

<bundles_post_ra>
// kernel: _compare_forward.1
= control target key start
LH: loop header
LB: loop body
LE: loop exit
PB: predicated region body
PF: predicated region fallthrough
CT: control target
= control target key end

     0   :  { %vm55_vm0 = vcmask 130048   ;;  %s521_s3 = inlined_call_operand.vmem [shape: bf16[16,128], index: 3, kind: input, shape index: {}]   ;;  %s522_s1 = inlined_call_operand.vmem [shape: bf16[32,16], index: 1, kind: input, shape index: {}]   ;;  %s523_s2 = inlined_call_operand.vmem [shape: bf16[16,128], index: 2, kind: input, shape index: {}]   ;;  %s524_s0 = inlined_call_operand.vmem [shape: bf16[32,16], index: 0, kind: input, shape index: {}]   ;;  %s525_s5 = inlined_call_operand.vmem [shape: bf16[128,128], index: 5, kind: input, shape index: {}]   ;;  %s526_s4 = inlined_call_operand.vmem [shape: f32[1,128], index: 4, kind: input, shape index: {}]   ;;  %s527_s6 = inlined_call_operand.vmem [shape: f32[1,128], index: 6, kind: input, shape index: {}]   ;;  %s528_s7 = inlined_call_operand.vmem [shape: f32[32,128], index: 7, kind: output, shape index: {}]  }
   0x1   :  { %v403_v0 = vld [vmem:[%s521_s3] sm:$0xff]   ;;  %v405_v2 = vld [vmem:[%s522_s1 + $0x8] sm:$0xff]   ;;  %v411_v7 = vld [vmem:[%s525_s5 + $0x10] sm:$0xff]  }
   0x2   :  { %v404_v1 = vld [vmem:[%s522_s1] sm:$0xff]   ;;  %367 = vmatprep.subr.bf16.mxu0 %v403_v0  ;;  %v410_v6 = vld [vmem:[%s525_s5 + $0x8] sm:$0xff]   ;;  %v412_v9 = vld [vmem:[%s525_s5 + $0x18] sm:$0xff]  }
   0x3   :  { %368 = vmatpush3.bf16.msra.mxu0 %v403_v0  ;;  %369 = vmatprep.mubr.msk.bf16.mxu0 %vm55_vm0, %v404_v1  ;;  %v406_v3 = vld [vmem:[%s523_s2] sm:$0xff]   ;;  %v408_v8 = vld [vmem:[%s524_s0 + $0x8] sm:$0xff]   ;;  %v415_v12 = vld [vmem:[%s525_s5 + $0x30] sm:$0xff]  }
   0x4   :  { %v407_v4 = vld [vmem:[%s524_s0] sm:$0xff]   ;;  %373 = vmatprep.subr.bf16.mxu0 %v406_v3  ;;  %v414_v11 = vld [vmem:[%s525_s5 + $0x28] sm:$0xff]   ;;  %v416_v13 = vld [vmem:[%s525_s5 + $0x38] sm:$0xff]  }
   0x5   :  { %v409_v5 = vld [vmem:[%s525_s5] sm:$0xff]  }
   0x6   :  { %370 = vmatmul.mubr.msk.bf16.vlgmr.msra.gmra.mrb[0].mxu0 %vm55_vm0, %v405_v2  ;;  %379 = vmatprep.subr.bf16.mxu1 %v409_v5  ;;  %v413_v10 = vld [vmem:[%s525_s5 + $0x20] sm:$0xff]  }
   0x7   :  { %374 = vmatpush3.bf16.msra.mxu0 %v406_v3  ;;  %375 = vmatprep.mubr.msk.bf16.mxu0 %vm55_vm0, %v407_v4  ;;  %v341_v14 = vld [vmem:[%s526_s4] ss:$0 sm:$0xff] }
   0x8   :  { %380 = vmatpush3.bf16.msra.mxu1 %v409_v5  ;;  %v342_v29 = vld [vmem:[%s527_s6] ss:$0 sm:$0xff] }
   0x9   :  { %381 = vmatprep.subr.bf16.mxu1 %v410_v6 }
   0xc   :  { %382 = vmatpush3.bf16.msra.mxu1 %v410_v6 }
   0xd   :  { %383 = vmatprep.subr.bf16.mxu1 %v411_v7 }
  0x10   :  { %384 = vmatpush3.bf16.msra.mxu1 %v411_v7 }
  0x11   :  { %385 = vmatprep.subr.bf16.mxu1 %v412_v9 }
  0x12   :  { %376 = vmatmul.mubr.msk.bf16.vlgmr.msra.gmra.mrb[0].mxu0 %vm55_vm0, %v408_v8 }
  0x14   :  { %386 = vmatpush3.bf16.msra.mxu1 %v412_v9 }
  0x15   :  { %387 = vmatprep.subr.bf16.mxu1 %v413_v10 }
  0x18   :  { %388 = vmatpush3.bf16.msra.mxu1 %v413_v10 }
  0x19   :  { %389 = vmatprep.subr.bf16.mxu1 %v414_v11 }
  0x1c   :  { %390 = vmatpush3.bf16.msra.mxu1 %v414_v11 }
  0x1d   :  { %391 = vmatprep.subr.bf16.mxu1 %v415_v12 }
  0x20   :  { %392 = vmatpush3.bf16.msra.mxu1 %v415_v12 }
  0x21   :  { %393 = vmatprep.subr.bf16.mxu1 %v416_v13 }
  0x24   :  { %394 = vmatpush3.bf16.msra.mxu1 %v416_v13 }
  0xe5   :  { %v377_v15 = vpop.f32.mrb[0].mxu0 }
  0xe6   :  { %v191_v16 = vadd.f32 %v377_v15, %v341_v14  ;;  %v167_v17 = vpop.f32.mrb[1].mxu0 }
  0xe7   :  { %v189_v18 = vadd.f32 %v341_v14, %v167_v17  ;;  %v378_v19 = vpop.f32.mrb[2].mxu0 }
  0xe8   :  { %v192_v20 = vadd.f32 %v378_v19, %v341_v14  ;;  %v170_v21 = vpop.f32.mrb[3].mxu0  ;;  %v195_v23 = vmax.f32 %v191_v16, 0.0 }
  0xe9   :  { %v190_v22 = vadd.f32 %v341_v14, %v170_v21  ;;  %v193_v25 = vmax.f32 %v189_v18, 0.0 }
  0xea   :  { %v196_v24 = vmax.f32 %v192_v20, 0.0 }
  0xeb   :  { %v194_v26 = vmax.f32 %v190_v22, 0.0 }
  0xec   :  { %v198_v27 = vpack.c.bf16 %v196_v24, %v195_v23 }
  0xed   :  { %v197_v28 = vpack.c.bf16 %v194_v26, %v193_v25 }
  0xef   :  { %395 = vmatprep.mubr.bf16.mxu1 %v197_v28 }
  0xf0   :  { %396 = vmatmul.mubr.bf16.vlgmr.msra.gmra.mrb[0].mxu1 %v198_v27 }
 0x1c3   :  { %v397_v30 = vpop.f32.mrb[0].mxu1 }
 0x1c4   :  { %v313_v31 = vadd.f32 %v397_v30, %v342_v29  ;;  %v304_v32 = vpop.f32.mrb[1].mxu1 }
 0x1c5   :  { %v305_v33 = vadd.f32 %v342_v29, %v304_v32  ;;  %v398_v34 = vpop.f32.mrb[2].mxu1 }
 0x1c6   :  { %v321_v35 = vmax.f32 %v313_v31, 0.0  ;;  %v316_v36 = vadd.f32 %v398_v34, %v342_v29  ;;  %v307_v37 = vpop.f32.mrb[3].mxu1 }
 0x1c7   :  { %v319_v38 = vmax.f32 %v305_v33, 0.0  ;;  %v308_v39 = vadd.f32 %v342_v29, %v307_v37 }
 0x1c8   :  { %325 = vst [vmem:[%s528_s7 + $0x10] sm:$0xff] %v321_v35  ;;  %v322_v40 = vmax.f32 %v316_v36, 0.0 }
 0x1c9   :  { %323 = vst [vmem:[%s528_s7] sm:$0xff] %v319_v38  ;;  %v320_v41 = vmax.f32 %v308_v39, 0.0 }
 0x1ca   :  { %326 = vst [vmem:[%s528_s7 + $0x18] sm:$0xff] %v322_v40 }
 0x1cb   :  { %324 = vst [vmem:[%s528_s7 + $0x8] sm:$0xff] %v320_v41 }

</bundles_post_ra>
